<compile_context>
chip_gen: v6e
topology: v6e:2x2x1
jax: 0.10.0
libtpu: 0.0.40
codegen_flags: <defaults>
</compile_context>

<pallas_src>
import jax
import jax.numpy as jnp
from jax.experimental import pallas as pl
from jax.experimental.pallas import tpu as pltpu


_COMPILER_PARAMS = pltpu.CompilerParams(
    dimension_semantics=("parallel",),     # split batch blocks across v7x TCs
    vmem_limit_bytes=32 * 1024 * 1024,     # KiB-scale tiles; safe on 64 MiB v7x
)


# ----------------------------- Pallas kernels ------------------------------

def _stage1_kernel(x_ref, w11_ref, b11_ref, inc_ref, binc_ref,
                   main_ref, sum_ref, sq_ref, pad_ref):
    """conv_1_1 -> inception (fused-K banded matmul) -> partial BN stats."""
    B, Hp, PWC = x_ref.shape
    nd = inc_ref.shape[0] // PWC                 # number of packed row shifts
    pad = (pad_ref.shape[1] - Hp) // 2

    # conv_1_1: one lane-dense bf16 MXU matmul, f32 accumulation.
    x2 = x_ref[...].reshape(B * Hp, PWC)
    tmp = jnp.dot(x2, w11_ref[...],
                  preferred_element_type=jnp.float32) + b11_ref[...]

    # Zero only the halo rows (cheap, megacore-safe), then write the interior.
    halo = jnp.zeros((B, pad, PWC), jnp.bfloat16)
    pad_ref[:, pl.ds(0, pad), :] = halo
    pad_ref[:, pl.ds(pad + Hp, pad), :] = halo
    pad_ref[:, pl.ds(pad, Hp), :] = tmp.reshape(B, Hp, PWC).astype(jnp.bfloat16)

    # Inception (pre-summed 1x1+3x3+5x5 bands) as ONE fused-K matmul:
    # concatenate the nd row-shifted slabs along lanes (K = nd * PWC).
    lhs = jnp.concatenate(
        [pad_ref[:, pl.ds(d, Hp), :].reshape(B * Hp, PWC) for d in range(nd)],
        axis=1)
    main = jnp.dot(lhs, inc_ref[...],
                   preferred_element_type=jnp.float32) + binc_ref[...]
    main_ref[...] = main.reshape(B, Hp, PWC)

    # Partial BatchNorm statistics for this block (f32).
    sum_ref[0] = jnp.sum(main, axis=0, keepdims=True)
    sq_ref[0] = jnp.sum(main * main, axis=0, keepdims=True)


def _stage2_kernel(main_ref, x_ref, scale_ref, shift_ref, w11_ref, b11_ref,
                   c33_ref, b33_ref, out_ref, pad_ref):
    """BN affine + ReLU -> conv_3_3 (fused-K) -> + conv_1_1(x) -> ReLU."""
    B, Hp, PWC = main_ref.shape
    nd = c33_ref.shape[0] // PWC
    pad = (pad_ref.shape[1] - Hp) // 2

    # Recompute tmp = conv_1_1(x): cheaper than a tmp HBM round-trip.
    x2 = x_ref[...].reshape(B * Hp, PWC)
    tmp = jnp.dot(x2, w11_ref[...],
                  preferred_element_type=jnp.float32) + b11_ref[...]

    # BatchNorm affine + ReLU on the main path (f32).
    m2 = main_ref[...].reshape(B * Hp, PWC)
    mbn = jnp.maximum(m2 * scale_ref[...] + shift_ref[...], 0.0)

    halo = jnp.zeros((B, pad, PWC), jnp.bfloat16)
    pad_ref[:, pl.ds(0, pad), :] = halo
    pad_ref[:, pl.ds(pad + Hp, pad), :] = halo
    pad_ref[:, pl.ds(pad, Hp), :] = mbn.reshape(B, Hp, PWC).astype(jnp.bfloat16)

    # conv_3_3 as ONE fused-K matmul over its packed row shifts.
    lhs = jnp.concatenate(
        [pad_ref[:, pl.ds(d, Hp), :].reshape(B * Hp, PWC) for d in range(nd)],
        axis=1)
    y = jnp.dot(lhs, c33_ref[...],
                preferred_element_type=jnp.float32) + b33_ref[...]

    out_ref[...] = jnp.maximum(y + tmp, 0.0).reshape(B, Hp, PWC)


# ------------------------------ pallas_call wrappers ------------------------

def _img_spec(B, Hp, PWC):
    return pl.BlockSpec((B, Hp, PWC), lambda n: (n, 0, 0))


def _const_spec(shape):
    return pl.BlockSpec(shape, lambda n: (0,) * len(shape))


def stage1(x, w11_band, b11_t, inc_cat, binc_t, B):
    N, Hp, PWC = x.shape
    G = N // B
    nd = inc_cat.shape[0] // PWC
    pad = (nd - 1) // 2
    return pl.pallas_call(
        _stage1_kernel,
        out_shape=(jax.ShapeDtypeStruct((N, Hp, PWC), jnp.float32),   # main (pre-BN)
                   jax.ShapeDtypeStruct((G, 1, PWC), jnp.float32),    # partial sum
                   jax.ShapeDtypeStruct((G, 1, PWC), jnp.float32)),   # partial sumsq
        grid=(G,),
        in_specs=[_img_spec(B, Hp, PWC),
                  _const_spec(w11_band.shape),
                  _const_spec(b11_t.shape),
                  _const_spec(inc_cat.shape),
                  _const_spec(binc_t.shape)],
        out_specs=(_img_spec(B, Hp, PWC),
                   pl.BlockSpec((1, 1, PWC), lambda n: (n, 0, 0)),
                   pl.BlockSpec((1, 1, PWC), lambda n: (n, 0, 0))),
        scratch_shapes=[pltpu.VMEM((B, Hp + 2 * pad, PWC), jnp.bfloat16)],
        compiler_params=_COMPILER_PARAMS,
    )(x, w11_band, b11_t, inc_cat, binc_t)


def stage2(main_pre, x, scale_t, shift_t, w11_band, b11_t, c33_cat, b33_t, B):
    N, Hp, PWC = main_pre.shape
    G = N // B
    nd = c33_cat.shape[0] // PWC
    pad = (nd - 1) // 2
    return pl.pallas_call(
        _stage2_kernel,
        out_shape=jax.ShapeDtypeStruct((N, Hp, PWC), jnp.float32),
        grid=(G,),
        in_specs=[_img_spec(B, Hp, PWC),          # main_pre (aliased with out)
                  _img_spec(B, Hp, PWC),          # x (bf16)
                  _const_spec(scale_t.shape),
                  _const_spec(shift_t.shape),
                  _const_spec(w11_band.shape),
                  _const_spec(b11_t.shape),
                  _const_spec(c33_cat.shape),
                  _const_spec(b33_t.shape)],
        out_specs=_img_spec(B, Hp, PWC),
        scratch_shapes=[pltpu.VMEM((B, Hp + 2 * pad, PWC), jnp.bfloat16)],
        input_output_aliases={0: 0},              # out overwrites main_pre
        compiler_params=_COMPILER_PARAMS,
    )(main_pre, x, scale_t, shift_t, w11_band, b11_t, c33_cat, b33_t)


# ------------------------------ host-side prep ------------------------------

def conv_banded(w, W, P, dmax):
    """PyTorch conv weight (Cout, Cin, kH, kW), 'same' padding, P image rows
    packed per lane row.  Returns (2*dmax+1, P*W*Cin, P*W*Cout) f32 bands s.t.
        out_packed[m] = sum_d in_packed[m + d - dmax] @ band[d]
    with packed rows outside the image treated as zeros.  W-direction 'same'
    padding is implicit in the band clipping."""
    cout, cin, kh, kw = w.shape
    ph, pw = kh // 2, kw // 2
    bands = []
    for d in range(-dmax, dmax + 1):
        blk = jnp.zeros((P, P, W * cin, W * cout), jnp.float32)
        for r_in in range(P):
            for r_out in range(P):
                ki = P * d + r_in - r_out + ph
                if not 0 <= ki < kh:
                    continue
                m = jnp.zeros((W * cin, W * cout), jnp.float32)
                for kj in range(kw):
                    dx = kj - pw
                    shift = jnp.eye(W, k=-dx, dtype=jnp.float32)  # [w_in, w_out]
                    tap = jnp.transpose(w[:, :, ki, kj], (1, 0))  # (Cin, Cout)
                    m = m + jnp.kron(shift, tap)
                blk = blk.at[r_in, r_out].set(m)
        bands.append(jnp.transpose(blk, (0, 2, 1, 3))
                     .reshape(P * W * cin, P * W * cout))
    return jnp.stack(bands, axis=0)


def _choose_packing(H, WC):
    """Smallest row-packing P (dividing H) that makes the lane axis >= 128."""
    P = 1
    while P * 2 <= 8 and H % (P * 2) == 0 and P * WC < 128:
        P *= 2
    return P


def _choose_block_batch(N, Hp, target_rows=256):
    """Largest divisor B of N with B*Hp <= target_rows while keeping >= 2 grid
    blocks (so both v7x TensorCores get work) whenever N >= 2."""
    best = 1
    for b in range(1, N + 1):
        if N % b == 0 and b * Hp <= target_rows and (N // b >= 2 or N == 1):
            best = b
    return best


def init_params(key, C):
    ks = jax.random.split(key, 10)

    def conv(kw_, kb_, k):
        fan_in = C * k * k
        w = jax.random.normal(kw_, (C, C, k, k), jnp.float32) / jnp.sqrt(fan_in)
        b = jax.random.normal(kb_, (C,), jnp.float32) * 0.01
        return w, b

    return {
        "conv_1_1": conv(ks[0], ks[1], 1),
        "inc_1": conv(ks[2], ks[3], 1),
        "inc_3": conv(ks[4], ks[5], 3),
        "inc_5": conv(ks[6], ks[7], 5),
        "conv_3_3": conv(ks[8], ks[9], 3),
        "bn_gamma": jnp.ones((C,), jnp.float32),
        "bn_beta": jnp.zeros((C,), jnp.float32),
    }


def process_forward(x_nchw, p):
    N, C, H, W = x_nchw.shape
    WC = W * C
    eps = 1e-5

    P = _choose_packing(H, WC)
    Hp = H // P
    PWC = P * WC
    B = _choose_block_batch(N, Hp)

    # NCHW -> (N, H/P, P*W*C), bf16 (MXU operand); lane = (packed_row, w, c).
    x_l = jnp.transpose(x_nchw, (0, 2, 3, 1)).reshape(N, Hp, PWC)
    x_l = x_l.astype(jnp.bfloat16)

    w11, b11 = p["conv_1_1"]
    w1, bb1 = p["inc_1"]
    w3, bb3 = p["inc_3"]
    w5, bb5 = p["inc_5"]
    w33, b33 = p["conv_3_3"]

    # Packed band matrices (bf16).  Inception bands sharing a row shift are
    # pre-summed across the 1x1/3x3/5x5 branches, then stacked along K.
    d_inc = (2 + P - 1) // P          # max H half-kernel among branches = 2
    d_33 = (1 + P - 1) // P
    w11_band = conv_banded(w11, W, P, 0)[0].astype(jnp.bfloat16)
    inc_cat = (conv_banded(w1, W, P, d_inc) + conv_banded(w3, W, P, d_inc)
               + conv_banded(w5, W, P, d_inc))
    inc_cat = inc_cat.reshape((2 * d_inc + 1) * PWC, PWC).astype(jnp.bfloat16)
    c33_cat = conv_banded(w33, W, P, d_33)
    c33_cat = c33_cat.reshape((2 * d_33 + 1) * PWC, PWC).astype(jnp.bfloat16)

    b11_t = jnp.tile(b11, P * W).reshape(1, PWC)
    binc_t = jnp.tile(bb1 + bb3 + bb5, P * W).reshape(1, PWC)
    b33_t = jnp.tile(b33, P * W).reshape(1, PWC)

    # Pass 1: main_pre = inception(conv_1_1(x)); per-block partial BN stats.
    main_pre, bn_sum, bn_sq = stage1(x_l, w11_band, b11_t, inc_cat, binc_t, B)

    # Global (training-mode, biased) BatchNorm stats -> folded affine (f32).
    cnt = N * H * W
    tot = bn_sum.reshape(-1, P * W, C).sum(axis=(0, 1))
    tot_sq = bn_sq.reshape(-1, P * W, C).sum(axis=(0, 1))
    mean = tot / cnt
    var = jnp.maximum(tot_sq / cnt - mean * mean, 0.0)
    inv = p["bn_gamma"] * jax.lax.rsqrt(var + eps)
    scale_t = jnp.tile(inv, P * W).reshape(1, PWC)
    shift_t = jnp.tile(p["bn_beta"] - mean * inv, P * W).reshape(1, PWC)

    # Pass 2: relu(bn(main)) -> conv_3_3 -> + conv_1_1(x) -> relu.
    out = stage2(main_pre, x_l, scale_t, shift_t, w11_band, b11_t,
                 c33_cat, b33_t, B)

    out = out.reshape(N, Hp, P, W, C).reshape(N, H, W, C)
    return jnp.transpose(out, (0, 3, 1, 2))                         # NCHW


if __name__ == "__main__":
    key = jax.random.PRNGKey(0)
    kx, kp = jax.random.split(key)
    N, C, H, W = 2, 4, 16, 16
    x = jax.random.normal(kx, (N, C, H, W), jnp.float32)
    params = init_params(kp, C)

    out = jax.jit(process_forward)(x, params)
    jax.block_until_ready(out)
    assert out.shape == (N, C, H, W)
    assert out.dtype == jnp.float32
    print("KERNEL_OK")
</pallas_src>

<mosaic_0001>
module attributes {stable_mosaic.version = 11 : i64} {
  func.func @_stage1_kernel(%arg0: i32, %arg1: memref<1x8x128xbf16, #tpu.memory_space<vmem>>, %arg2: memref<128x128xbf16, #tpu.memory_space<vmem>>, %arg3: memref<1x128xf32, #tpu.memory_space<vmem>>, %arg4: memref<384x128xbf16, #tpu.memory_space<vmem>>, %arg5: memref<1x128xf32, #tpu.memory_space<vmem>>, %arg6: memref<1x8x128xf32, #tpu.memory_space<vmem>>, %arg7: memref<1x1x128xf32, #tpu.memory_space<vmem>>, %arg8: memref<1x1x128xf32, #tpu.memory_space<vmem>>, %arg9: memref<1x10x128xbf16, #tpu.memory_space<vmem>>) attributes {dimension_semantics = [#tpu.dimension_semantics<parallel>], iteration_bounds = array<i64: 2>, scalar_prefetch = 0 : i64, scratch_operands = 1 : i64, tpu.core_type = #tpu.core_type<tc>, window_params = [{transform_indices = @transform_0, window_bounds = array<i64: 1, 8, 128>}, {pipeline_mode = #tpu.pipeline_mode<synchronous>, transform_indices = @transform_1, window_bounds = array<i64: 128, 128>}, {pipeline_mode = #tpu.pipeline_mode<synchronous>, transform_indices = @transform_2, window_bounds = array<i64: 1, 128>}, {pipeline_mode = #tpu.pipeline_mode<synchronous>, transform_indices = @transform_3, window_bounds = array<i64: 384, 128>}, {pipeline_mode = #tpu.pipeline_mode<synchronous>, transform_indices = @transform_4, window_bounds = array<i64: 1, 128>}, {transform_indices = @transform_5, window_bounds = array<i64: 1, 8, 128>}, {transform_indices = @transform_6, window_bounds = array<i64: 1, 1, 128>}, {transform_indices = @transform_7, window_bounds = array<i64: 1, 1, 128>}]} {
    %c0 = arith.constant 0 : index
    %c0_0 = arith.constant 0 : index
    %c0_1 = arith.constant 0 : index
    %0 = vector.load %arg1[%c0, %c0_0, %c0_1] : memref<1x8x128xbf16, #tpu.memory_space<vmem>>, vector<1x8x128xbf16>
    %1 = vector.shape_cast %0 : vector<1x8x128xbf16> to vector<8x128xbf16>
    %c0_2 = arith.constant 0 : index
    %c0_3 = arith.constant 0 : index
    %2 = vector.load %arg2[%c0_2, %c0_3] : memref<128x128xbf16, #tpu.memory_space<vmem>>, vector<128x128xbf16>
    %cst = arith.constant dense<0.000000e+00> : vector<8x128xf32>
    %3 = tpu.matmul %1, %2, %cst {dimension_numbers = #tpu.dot_dimension_numbers<[1], [0], [0], [1], [0, 0, 1, 1], [], []>} : vector<8x128xbf16>, vector<128x128xbf16>, vector<8x128xf32> -> vector<8x128xf32>
    %c0_4 = arith.constant 0 : index
    %c0_5 = arith.constant 0 : index
    %4 = vector.load %arg3[%c0_4, %c0_5] : memref<1x128xf32, #tpu.memory_space<vmem>>, vector<1x128xf32>
    %5 = vector.broadcast %4 : vector<1x128xf32> to vector<8x128xf32>
    %6 = arith.addf %3, %5 : vector<8x128xf32>
    %cst_6 = arith.constant 0.000000e+00 : bf16
    %7 = vector.broadcast %cst_6 : bf16 to vector<1x1x128xbf16>
    %c0_7 = arith.constant 0 : index
    %c0_8 = arith.constant 0 : index
    %c0_9 = arith.constant 0 : index
    %8 = vector.load %arg9[%c0_7, %c0_8, %c0_9] : memref<1x10x128xbf16, #tpu.memory_space<vmem>>, vector<1x1x128xbf16>
    tpu.vector_store %arg9[%c0_7, %c0_8, %c0_9], %7 {strides = array<i32>} : memref<1x10x128xbf16, #tpu.memory_space<vmem>>, vector<1x1x128xbf16>,
    %c0_10 = arith.constant 0 : index
    %c9 = arith.constant 9 : index
    %c0_11 = arith.constant 0 : index
    %9 = vector.load %arg9[%c0_10, %c9, %c0_11] : memref<1x10x128xbf16, #tpu.memory_space<vmem>>, vector<1x1x128xbf16>
    tpu.vector_store %arg9[%c0_10, %c9, %c0_11], %7 {strides = array<i32>} : memref<1x10x128xbf16, #tpu.memory_space<vmem>>, vector<1x1x128xbf16>,
    %10 = vector.shape_cast %6 : vector<8x128xf32> to vector<1x8x128xf32>
    %11 = arith.truncf %10 : vector<1x8x128xf32> to vector<1x8x128xbf16>
    %c0_12 = arith.constant 0 : index
    %c1 = arith.constant 1 : index
    %c0_13 = arith.constant 0 : index
    %12 = vector.load %arg9[%c0_12, %c1, %c0_13] : memref<1x10x128xbf16, #tpu.memory_space<vmem>>, vector<1x8x128xbf16>
    tpu.vector_store %arg9[%c0_12, %c1, %c0_13], %11 {strides = array<i32>} : memref<1x10x128xbf16, #tpu.memory_space<vmem>>, vector<1x8x128xbf16>,
    %c0_14 = arith.constant 0 : index
    %c0_15 = arith.constant 0 : index
    %c0_16 = arith.constant 0 : index
    %13 = vector.load %arg9[%c0_14, %c0_15, %c0_16] : memref<1x10x128xbf16, #tpu.memory_space<vmem>>, vector<1x8x128xbf16>
    %14 = vector.shape_cast %13 : vector<1x8x128xbf16> to vector<8x128xbf16>
    %c0_17 = arith.constant 0 : index
    %c1_18 = arith.constant 1 : index
    %c0_19 = arith.constant 0 : index
    %15 = vector.load %arg9[%c0_17, %c1_18, %c0_19] : memref<1x10x128xbf16, #tpu.memory_space<vmem>>, vector<1x8x128xbf16>
    %16 = vector.shape_cast %15 : vector<1x8x128xbf16> to vector<8x128xbf16>
    %c0_20 = arith.constant 0 : index
    %c2 = arith.constant 2 : index
    %c0_21 = arith.constant 0 : index
    %17 = vector.load %arg9[%c0_20, %c2, %c0_21] : memref<1x10x128xbf16, #tpu.memory_space<vmem>>, vector<1x8x128xbf16>
    %18 = vector.shape_cast %17 : vector<1x8x128xbf16> to vector<8x128xbf16>
    %19 = tpu.concatenate %14, %16, %18 in 1 : vector<8x128xbf16>, vector<8x128xbf16>, vector<8x128xbf16> -> vector<8x384xbf16>
    %c0_22 = arith.constant 0 : index
    %c0_23 = arith.constant 0 : index
    %20 = vector.load %arg4[%c0_22, %c0_23] : memref<384x128xbf16, #tpu.memory_space<vmem>>, vector<384x128xbf16>
    %cst_24 = arith.constant dense<0.000000e+00> : vector<8x128xf32>
    %21 = tpu.matmul %19, %20, %cst_24 {dimension_numbers = #tpu.dot_dimension_numbers<[1], [0], [0], [1], [0, 0, 1, 1], [], []>} : vector<8x384xbf16>, vector<384x128xbf16>, vector<8x128xf32> -> vector<8x128xf32>
    %c0_25 = arith.constant 0 : index
    %c0_26 = arith.constant 0 : index
    %22 = vector.load %arg5[%c0_25, %c0_26] : memref<1x128xf32, #tpu.memory_space<vmem>>, vector<1x128xf32>
    %23 = vector.broadcast %22 : vector<1x128xf32> to vector<8x128xf32>
    %24 = arith.addf %21, %23 : vector<8x128xf32>
    %25 = vector.shape_cast %24 : vector<8x128xf32> to vector<1x8x128xf32>
    %c0_27 = arith.constant 0 : index
    %c0_28 = arith.constant 0 : index
    %c0_29 = arith.constant 0 : index
    %26 = vector.load %arg6[%c0_27, %c0_28, %c0_29] : memref<1x8x128xf32, #tpu.memory_space<vmem>>, vector<1x8x128xf32>
    tpu.vector_store %arg6[%c0_27, %c0_28, %c0_29], %25 {strides = array<i32>} : memref<1x8x128xf32, #tpu.memory_space<vmem>>, vector<1x8x128xf32>,
    %cst_30 = arith.constant dense<0.000000e+00> : vector<128xf32>
    %27 = vector.multi_reduction <add>, %24, %cst_30 [0] : vector<8x128xf32> to vector<128xf32>
    %28 = vector.shape_cast %27 : vector<128xf32> to vector<1x128xf32>
    %c0_31 = arith.constant 0 : index
    %c0_32 = arith.constant 0 : index
    %c0_33 = arith.constant 0 : index
    %29 = vector.load %arg7[%c0_31, %c0_32, %c0_33] : memref<1x1x128xf32, #tpu.memory_space<vmem>>, vector<1x1x128xf32>
    %30 = vector.shape_cast %29 : vector<1x1x128xf32> to vector<1x128xf32>
    %31 = vector.shape_cast %28 : vector<1x128xf32> to vector<1x1x128xf32>
    tpu.vector_store %arg7[%c0_31, %c0_32, %c0_33], %31 {strides = array<i32>} : memref<1x1x128xf32, #tpu.memory_space<vmem>>, vector<1x1x128xf32>,
    %32 = arith.mulf %24, %24 : vector<8x128xf32>
    %cst_34 = arith.constant dense<0.000000e+00> : vector<128xf32>
    %33 = vector.multi_reduction <add>, %32, %cst_34 [0] : vector<8x128xf32> to vector<128xf32>
    %34 = vector.shape_cast %33 : vector<128xf32> to vector<1x128xf32>
    %c0_35 = arith.constant 0 : index
    %c0_36 = arith.constant 0 : index
    %c0_37 = arith.constant 0 : index
    %35 = vector.load %arg8[%c0_35, %c0_36, %c0_37] : memref<1x1x128xf32, #tpu.memory_space<vmem>>, vector<1x1x128xf32>
    %36 = vector.shape_cast %35 : vector<1x1x128xf32> to vector<1x128xf32>
    %37 = vector.shape_cast %34 : vector<1x128xf32> to vector<1x1x128xf32>
    tpu.vector_store %arg8[%c0_35, %c0_36, %c0_37], %37 {strides = array<i32>} : memref<1x1x128xf32, #tpu.memory_space<vmem>>, vector<1x1x128xf32>,
    return
  }
  func.func @transform_0(%arg0: i32) -> (i32, i32, i32) {
    %c0_i32 = arith.constant 0 : i32
    %c0_i32_0 = arith.constant 0 : i32
    %c0_i32_1 = arith.constant 0 : i32
    return %arg0, %c0_i32, %c0_i32_0 : i32, i32, i32
  }
  func.func @transform_1(%arg0: i32) -> (i32, i32) {
    %c0_i32 = arith.constant 0 : i32
    %c0_i32_0 = arith.constant 0 : i32
    %c0_i32_1 = arith.constant 0 : i32
    return %c0_i32, %c0_i32_0 : i32, i32
  }
  func.func @transform_2(%arg0: i32) -> (i32, i32) {
    %c0_i32 = arith.constant 0 : i32
    %c0_i32_0 = arith.constant 0 : i32
    %c0_i32_1 = arith.constant 0 : i32
    return %c0_i32, %c0_i32_0 : i32, i32
  }
  func.func @transform_3(%arg0: i32) -> (i32, i32) {
    %c0_i32 = arith.constant 0 : i32
    %c0_i32_0 = arith.constant 0 : i32
    %c0_i32_1 = arith.constant 0 : i32
    return %c0_i32, %c0_i32_0 : i32, i32
  }
  func.func @transform_4(%arg0: i32) -> (i32, i32) {
    %c0_i32 = arith.constant 0 : i32
    %c0_i32_0 = arith.constant 0 : i32
    %c0_i32_1 = arith.constant 0 : i32
    return %c0_i32, %c0_i32_0 : i32, i32
  }
  func.func @transform_5(%arg0: i32) -> (i32, i32, i32) {
    %c0_i32 = arith.constant 0 : i32
    %c0_i32_0 = arith.constant 0 : i32
    %c0_i32_1 = arith.constant 0 : i32
    return %arg0, %c0_i32, %c0_i32_0 : i32, i32, i32
  }
  func.func @transform_6(%arg0: i32) -> (i32, i32, i32) {
    %c0_i32 = arith.constant 0 : i32
    %c0_i32_0 = arith.constant 0 : i32
    %c0_i32_1 = arith.constant 0 : i32
    return %arg0, %c0_i32, %c0_i32_0 : i32, i32, i32
  }
  func.func @transform_7(%arg0: i32) -> (i32, i32, i32) {
    %c0_i32 = arith.constant 0 : i32
    %c0_i32_0 = arith.constant 0 : i32
    %c0_i32_1 = arith.constant 0 : i32
    return %arg0, %c0_i32, %c0_i32_0 : i32, i32, i32
  }
}

module attributes {stable_mosaic.version = 11 : i64} {
  func.func @_stage2_kernel(%arg0: i32, %arg1: memref<1x8x128xf32, #tpu.memory_space<vmem>>, %arg2: memref<1x8x128xbf16, #tpu.memory_space<vmem>>, %arg3: memref<1x128xf32, #tpu.memory_space<vmem>>, %arg4: memref<1x128xf32, #tpu.memory_space<vmem>>, %arg5: memref<128x128xbf16, #tpu.memory_space<vmem>>, %arg6: memref<1x128xf32, #tpu.memory_space<vmem>>, %arg7: memref<384x128xbf16, #tpu.memory_space<vmem>>, %arg8: memref<1x128xf32, #tpu.memory_space<vmem>>, %arg9: memref<1x8x128xf32, #tpu.memory_space<vmem>>, %arg10: memref<1x10x128xbf16, #tpu.memory_space<vmem>>) attributes {dimension_semantics = [#tpu.dimension_semantics<parallel>], iteration_bounds = array<i64: 2>, scalar_prefetch = 0 : i64, scratch_operands = 1 : i64, tpu.core_type = #tpu.core_type<tc>, window_params = [{transform_indices = @transform_0, window_bounds = array<i64: 1, 8, 128>}, {transform_indices = @transform_1, window_bounds = array<i64: 1, 8, 128>}, {pipeline_mode = #tpu.pipeline_mode<synchronous>, transform_indices = @transform_2, window_bounds = array<i64: 1, 128>}, {pipeline_mode = #tpu.pipeline_mode<synchronous>, transform_indices = @transform_3, window_bounds = array<i64: 1, 128>}, {pipeline_mode = #tpu.pipeline_mode<synchronous>, transform_indices = @transform_4, window_bounds = array<i64: 128, 128>}, {pipeline_mode = #tpu.pipeline_mode<synchronous>, transform_indices = @transform_5, window_bounds = array<i64: 1, 128>}, {pipeline_mode = #tpu.pipeline_mode<synchronous>, transform_indices = @transform_6, window_bounds = array<i64: 384, 128>}, {pipeline_mode = #tpu.pipeline_mode<synchronous>, transform_indices = @transform_7, window_bounds = array<i64: 1, 128>}, {transform_indices = @transform_8, window_bounds = array<i64: 1, 8, 128>}]} {
    %c0 = arith.constant 0 : index
    %c0_0 = arith.constant 0 : index
    %c0_1 = arith.constant 0 : index
    %0 = vector.load %arg2[%c0, %c0_0, %c0_1] : memref<1x8x128xbf16, #tpu.memory_space<vmem>>, vector<1x8x128xbf16>
    %1 = vector.shape_cast %0 : vector<1x8x128xbf16> to vector<8x128xbf16>
    %c0_2 = arith.constant 0 : index
    %c0_3 = arith.constant 0 : index
    %2 = vector.load %arg5[%c0_2, %c0_3] : memref<128x128xbf16, #tpu.memory_space<vmem>>, vector<128x128xbf16>
    %cst = arith.constant dense<0.000000e+00> : vector<8x128xf32>
    %3 = tpu.matmul %1, %2, %cst {dimension_numbers = #tpu.dot_dimension_numbers<[1], [0], [0], [1], [0, 0, 1, 1], [], []>} : vector<8x128xbf16>, vector<128x128xbf16>, vector<8x128xf32> -> vector<8x128xf32>
    %c0_4 = arith.constant 0 : index
    %c0_5 = arith.constant 0 : index
    %4 = vector.load %arg6[%c0_4, %c0_5] : memref<1x128xf32, #tpu.memory_space<vmem>>, vector<1x128xf32>
    %5 = vector.broadcast %4 : vector<1x128xf32> to vector<8x128xf32>
    %6 = arith.addf %3, %5 : vector<8x128xf32>
    %c0_6 = arith.constant 0 : index
    %c0_7 = arith.constant 0 : index
    %c0_8 = arith.constant 0 : index
    %7 = vector.load %arg1[%c0_6, %c0_7, %c0_8] : memref<1x8x128xf32, #tpu.memory_space<vmem>>, vector<1x8x128xf32>
    %8 = vector.shape_cast %7 : vector<1x8x128xf32> to vector<8x128xf32>
    %c0_9 = arith.constant 0 : index
    %c0_10 = arith.constant 0 : index
    %9 = vector.load %arg3[%c0_9, %c0_10] : memref<1x128xf32, #tpu.memory_space<vmem>>, vector<1x128xf32>
    %10 = vector.broadcast %9 : vector<1x128xf32> to vector<8x128xf32>
    %11 = arith.mulf %8, %10 : vector<8x128xf32>
    %c0_11 = arith.constant 0 : index
    %c0_12 = arith.constant 0 : index
    %12 = vector.load %arg4[%c0_11, %c0_12] : memref<1x128xf32, #tpu.memory_space<vmem>>, vector<1x128xf32>
    %13 = vector.broadcast %12 : vector<1x128xf32> to vector<8x128xf32>
    %14 = arith.addf %11, %13 : vector<8x128xf32>
    %cst_13 = arith.constant 0.000000e+00 : f32
    %15 = vector.broadcast %cst_13 : f32 to vector<8x128xf32>
    %16 = arith.maximumf %14, %15 : vector<8x128xf32>
    %cst_14 = arith.constant 0.000000e+00 : bf16
    %17 = vector.broadcast %cst_14 : bf16 to vector<1x1x128xbf16>
    %c0_15 = arith.constant 0 : index
    %c0_16 = arith.constant 0 : index
    %c0_17 = arith.constant 0 : index
    %18 = vector.load %arg10[%c0_15, %c0_16, %c0_17] : memref<1x10x128xbf16, #tpu.memory_space<vmem>>, vector<1x1x128xbf16>
    tpu.vector_store %arg10[%c0_15, %c0_16, %c0_17], %17 {strides = array<i32>} : memref<1x10x128xbf16, #tpu.memory_space<vmem>>, vector<1x1x128xbf16>,
    %c0_18 = arith.constant 0 : index
    %c9 = arith.constant 9 : index
    %c0_19 = arith.constant 0 : index
    %19 = vector.load %arg10[%c0_18, %c9, %c0_19] : memref<1x10x128xbf16, #tpu.memory_space<vmem>>, vector<1x1x128xbf16>
    tpu.vector_store %arg10[%c0_18, %c9, %c0_19], %17 {strides = array<i32>} : memref<1x10x128xbf16, #tpu.memory_space<vmem>>, vector<1x1x128xbf16>,
    %20 = vector.shape_cast %16 : vector<8x128xf32> to vector<1x8x128xf32>
    %21 = arith.truncf %20 : vector<1x8x128xf32> to vector<1x8x128xbf16>
    %c0_20 = arith.constant 0 : index
    %c1 = arith.constant 1 : index
    %c0_21 = arith.constant 0 : index
    %22 = vector.load %arg10[%c0_20, %c1, %c0_21] : memref<1x10x128xbf16, #tpu.memory_space<vmem>>, vector<1x8x128xbf16>
    tpu.vector_store %arg10[%c0_20, %c1, %c0_21], %21 {strides = array<i32>} : memref<1x10x128xbf16, #tpu.memory_space<vmem>>, vector<1x8x128xbf16>,
    %c0_22 = arith.constant 0 : index
    %c0_23 = arith.constant 0 : index
    %c0_24 = arith.constant 0 : index
    %23 = vector.load %arg10[%c0_22, %c0_23, %c0_24] : memref<1x10x128xbf16, #tpu.memory_space<vmem>>, vector<1x8x128xbf16>
    %24 = vector.shape_cast %23 : vector<1x8x128xbf16> to vector<8x128xbf16>
    %c0_25 = arith.constant 0 : index
    %c1_26 = arith.constant 1 : index
    %c0_27 = arith.constant 0 : index
    %25 = vector.load %arg10[%c0_25, %c1_26, %c0_27] : memref<1x10x128xbf16, #tpu.memory_space<vmem>>, vector<1x8x128xbf16>
    %26 = vector.shape_cast %25 : vector<1x8x128xbf16> to vector<8x128xbf16>
    %c0_28 = arith.constant 0 : index
    %c2 = arith.constant 2 : index
    %c0_29 = arith.constant 0 : index
    %27 = vector.load %arg10[%c0_28, %c2, %c0_29] : memref<1x10x128xbf16, #tpu.memory_space<vmem>>, vector<1x8x128xbf16>
    %28 = vector.shape_cast %27 : vector<1x8x128xbf16> to vector<8x128xbf16>
    %29 = tpu.concatenate %24, %26, %28 in 1 : vector<8x128xbf16>, vector<8x128xbf16>, vector<8x128xbf16> -> vector<8x384xbf16>
    %c0_30 = arith.constant 0 : index
    %c0_31 = arith.constant 0 : index
    %30 = vector.load %arg7[%c0_30, %c0_31] : memref<384x128xbf16, #tpu.memory_space<vmem>>, vector<384x128xbf16>
    %cst_32 = arith.constant dense<0.000000e+00> : vector<8x128xf32>
    %31 = tpu.matmul %29, %30, %cst_32 {dimension_numbers = #tpu.dot_dimension_numbers<[1], [0], [0], [1], [0, 0, 1, 1], [], []>} : vector<8x384xbf16>, vector<384x128xbf16>, vector<8x128xf32> -> vector<8x128xf32>
    %c0_33 = arith.constant 0 : index
    %c0_34 = arith.constant 0 : index
    %32 = vector.load %arg8[%c0_33, %c0_34] : memref<1x128xf32, #tpu.memory_space<vmem>>, vector<1x128xf32>
    %33 = vector.broadcast %32 : vector<1x128xf32> to vector<8x128xf32>
    %34 = arith.addf %31, %33 : vector<8x128xf32>
    %35 = arith.addf %34, %6 : vector<8x128xf32>
    %cst_35 = arith.constant 0.000000e+00 : f32
    %36 = vector.broadcast %cst_35 : f32 to vector<8x128xf32>
    %37 = arith.maximumf %35, %36 : vector<8x128xf32>
    %38 = vector.shape_cast %37 : vector<8x128xf32> to vector<1x8x128xf32>
    %c0_36 = arith.constant 0 : index
    %c0_37 = arith.constant 0 : index
    %c0_38 = arith.constant 0 : index
    %39 = vector.load %arg9[%c0_36, %c0_37, %c0_38] : memref<1x8x128xf32, #tpu.memory_space<vmem>>, vector<1x8x128xf32>
    tpu.vector_store %arg9[%c0_36, %c0_37, %c0_38], %38 {strides = array<i32>} : memref<1x8x128xf32, #tpu.memory_space<vmem>>, vector<1x8x128xf32>,
    return
  }
  func.func @transform_0(%arg0: i32) -> (i32, i32, i32) {
    %c0_i32 = arith.constant 0 : i32
    %c0_i32_0 = arith.constant 0 : i32
    %c0_i32_1 = arith.constant 0 : i32
    return %arg0, %c0_i32, %c0_i32_0 : i32, i32, i32
  }
  func.func @transform_1(%arg0: i32) -> (i32, i32, i32) {
    %c0_i32 = arith.constant 0 : i32
    %c0_i32_0 = arith.constant 0 : i32
    %c0_i32_1 = arith.constant 0 : i32
    return %arg0, %c0_i32, %c0_i32_0 : i32, i32, i32
  }
  func.func @transform_2(%arg0: i32) -> (i32, i32) {
    %c0_i32 = arith.constant 0 : i32
    %c0_i32_0 = arith.constant 0 : i32
    %c0_i32_1 = arith.constant 0 : i32
    return %c0_i32, %c0_i32_0 : i32, i32
  }
  func.func @transform_3(%arg0: i32) -> (i32, i32) {
    %c0_i32 = arith.constant 0 : i32
    %c0_i32_0 = arith.constant 0 : i32
    %c0_i32_1 = arith.constant 0 : i32
    return %c0_i32, %c0_i32_0 : i32, i32
  }
  func.func @transform_4(%arg0: i32) -> (i32, i32) {
    %c0_i32 = arith.constant 0 : i32
    %c0_i32_0 = arith.constant 0 : i32
    %c0_i32_1 = arith.constant 0 : i32
    return %c0_i32, %c0_i32_0 : i32, i32
  }
  func.func @transform_5(%arg0: i32) -> (i32, i32) {
    %c0_i32 = arith.constant 0 : i32
    %c0_i32_0 = arith.constant 0 : i32
    %c0_i32_1 = arith.constant 0 : i32
    return %c0_i32, %c0_i32_0 : i32, i32
  }
  func.func @transform_6(%arg0: i32) -> (i32, i32) {
    %c0_i32 = arith.constant 0 : i32
    %c0_i32_0 = arith.constant 0 : i32
    %c0_i32_1 = arith.constant 0 : i32
    return %c0_i32, %c0_i32_0 : i32, i32
  }
  func.func @transform_7(%arg0: i32) -> (i32, i32) {
    %c0_i32 = arith.constant 0 : i32
    %c0_i32_0 = arith.constant 0 : i32
    %c0_i32_1 = arith.constant 0 : i32
    return %c0_i32, %c0_i32_0 : i32, i32
  }
  func.func @transform_8(%arg0: i32) -> (i32, i32, i32) {
    %c0_i32 = arith.constant 0 : i32
    %c0_i32_0 = arith.constant 0 : i32
    %c0_i32_1 = arith.constant 0 : i32
    return %arg0, %c0_i32, %c0_i32_0 : i32, i32, i32
  }
}

</mosaic_0001>

<bundles_post_ra>
// kernel: tile.28
= control target key start
LH: loop header
LB: loop body
LE: loop exit
PB: predicated region body
PF: predicated region fallthrough
CT: control target
= control target key end

     0   :  { %s40_s0 = inlined_call_operand.vmem [shape: f32[4], index: 0, kind: input, shape index: {}]   ;;  %s41_s1 = inlined_call_operand.vmem [shape: f32[32,4], index: 1, kind: output, shape index: {}]  }
   0x1   :  { %v4_v0 = vld [vmem:[%s40_s0] ss:$0 sm:$0xff] }
   0x2   :  { %5 = vst [vmem:[%s41_s1] sm:$0xff] %v4_v0  ;;  %12 = vst [vmem:[%s41_s1 + $0x8] sm:$0xff] %v4_v0 }
   0x3   :  { %13 = vst [vmem:[%s41_s1 + $0x10] sm:$0xff] %v4_v0  ;;  %14 = vst [vmem:[%s41_s1 + $0x18] sm:$0xff] %v4_v0 }

// kernel: tile.29
= control target key start
LH: loop header
LB: loop body
LE: loop exit
PB: predicated region body
PF: predicated region fallthrough
CT: control target
= control target key end

     0   :  { %s261_s10 = smov 124   ;;  %s262_s11 = smov 116   ;;  %vm3_vm0 = vcmask 31744   ;;  %vm9_vm1 = vcmask 1048544   ;;  %vm15_vm2 = vcmask 1015744   ;;  %vm21_vm3 = vcmask 982944   ;;  %s401_s0 = inlined_call_operand.vmem [shape: f32[32,4], index: 0, kind: input, shape index: {}]   ;;  %s402_s1 = inlined_call_operand.vmem [shape: f32[1,128], index: 1, kind: output, shape index: {}]  }
   0x1   :  { %v199_v0 = vld [vmem:[%s401_s0 + $0x1f] sm:$0x1]   ;;  %v201_v1 = vld [vmem:[%s401_s0 + $0x1d] sm:$0x1]   ;;  %v200_v2 = vld [vmem:[%s401_s0 + $0x1e] sm:$0x1]  }
   0x2   :  { %7 = vrot.lane.b32.xlu0 %v199_v0, %s261_s10  ;;  %19 = vrot.lane.b32.xlu1 %v201_v1, %s262_s11  ;;  %v202_v3 = vld [vmem:[%s401_s0 + $0x1c] sm:$0x1]   ;;  %s263_s16 = smov 120   ;;  %s264_s17 = smov 112   ;;  %v203_v4 = vld [vmem:[%s401_s0 + $0x1b] sm:$0x1]  }
   0x3   :  { %v204_v5 = vld [vmem:[%s401_s0 + $0x1a] sm:$0x1]   ;;  %s265_s22 = smov 108   ;;  %s266_s23 = smov 104   ;;  %v205_v6 = vld [vmem:[%s401_s0 + $0x19] sm:$0x1]  }
   0x4   :  { %v206_v7 = vld [vmem:[%s401_s0 + $0x18] sm:$0x1]   ;;  %s267_s28 = smov 100   ;;  %s268_s29 = smov 96   ;;  %v207_v8 = vld [vmem:[%s401_s0 + $0x17] sm:$0x1]  }
   0x5   :  { %v208_v9 = vld [vmem:[%s401_s0 + $0x16] sm:$0x1]   ;;  %v2_v10 = vld [vmem:[%s401_s0] sm:$0x1]   ;;  %s269_s7 = smov 92   ;;  %s270_s8 = smov 88  }
   0x6   :  { %13 = vrot.lane.b32.xlu0 %v200_v2, %s263_s16  ;;  %25 = vrot.lane.b32.xlu1 %v202_v3, %s264_s17  ;;  %4 = vst.msk [vmem:[#allocation0] sm:$0x1] %vm3_vm0, %v2_v10   ;;  %v209_v11 = vld [vmem:[%s401_s0 + $0x15] sm:$0x1]   ;;  %v210_v12 = vld [vmem:[%s401_s0 + $0x14] sm:$0x1]  }
   0x7   :  { %s271_s13 = smov 84   ;;  %s272_s14 = smov 80   ;;  %v211_v13 = vld [vmem:[%s401_s0 + $0x13] sm:$0x1]   ;;  %v212_v14 = vld [vmem:[%s401_s0 + $0x12] sm:$0x1]  }
   0x8   :  { %s273_s19 = smov 76   ;;  %s274_s20 = smov 72   ;;  %v213_v15 = vld [vmem:[%s401_s0 + $0x11] sm:$0x1]   ;;  %v214_v16 = vld [vmem:[%s401_s0 + $0x10] sm:$0x1]  }
   0x9   :  { %s275_s25 = smov 68   ;;  %s276_s26 = smov 64   ;;  %v215_v17 = vld [vmem:[%s401_s0 + $0xf] sm:$0x1]   ;;  %v216_v18 = vld [vmem:[%s401_s0 + $0xe] sm:$0x1]  }
   0xa   :  { %31 = vrot.lane.b32.xlu0 %v203_v4, %s265_s22  ;;  %37 = vrot.lane.b32.xlu1 %v204_v5, %s266_s23  ;;  %s277_s2 = smov 60   ;;  %s278_s3 = smov 56   ;;  %v217_v19 = vld [vmem:[%s401_s0 + $0xd] sm:$0x1]   ;;  %v218_v20 = vld [vmem:[%s401_s0 + $0xc] sm:$0x1]  }
   0xb   :  { %s280_s9 = smov 48   ;;  %v219_v21 = vld [vmem:[%s401_s0 + $0xb] sm:$0x1]   ;;  %v220_v22 = vld [vmem:[%s401_s0 + $0xa] sm:$0x1]   ;;  %s282_s15 = smov 40  }
   0xc   :  { %v221_v23 = vld [vmem:[%s401_s0 + $0x9] sm:$0x1]   ;;  %v222_v24 = vld [vmem:[%s401_s0 + $0x8] sm:$0x1]   ;;  %s284_s21 = smov 32   ;;  %s286_s27 = smov 24  }
   0xd   :  { %v223_v25 = vld [vmem:[%s401_s0 + $0x7] sm:$0x1]   ;;  %v224_v26 = vld [vmem:[%s401_s0 + $0x6] sm:$0x1]   ;;  %v225_v27 = vld [vmem:[%s401_s0 + $0x5] sm:$0x1]  }
   0xe   :  { %43 = vrot.lane.b32.xlu0 %v205_v6, %s267_s28  ;;  %49 = vrot.lane.b32.xlu1 %v206_v7, %s268_s29  ;;  %v226_v28 = vld [vmem:[%s401_s0 + $0x4] sm:$0x1]   ;;  %s288_s4 = smov 16   ;;  %v227_v29 = vld [vmem:[%s401_s0 + $0x3] sm:$0x1]   ;;  %s290_s10 = smov 8  }
   0xf   :  { %v228_v30 = vld [vmem:[%s401_s0 + $0x2] sm:$0x1]   ;;  %v229_v31 = vld [vmem:[%s401_s0 + $0x1] sm:$0x1]   ;;  %s291_s0 = smov 4   ;;  %vm27_vm4 = vcmask 950144  }
  0x10   :  { %vm33_vm5 = vcmask 917344   ;;  %vm39_vm6 = vcmask 884544   ;;  %vm45_vm7 = vcmask 851744   ;;  %vm51_vm8 = vcmask 818944  }
  0x11   :  { %vm57_vm9 = vcmask 786144   ;;  %vm63_vm10 = vcmask 753344   ;;  %vm69_vm11 = vcmask 720544   ;;  %vm75_vm12 = vcmask 687744  }
  0x12   :  { %55 = vrot.lane.b32.xlu0 %v207_v8, %s269_s7  ;;  %61 = vrot.lane.b32.xlu1 %v208_v9, %s270_s8  ;;  %s279_s8 = smov 52   ;;  %vm81_vm13 = vcmask 654944   ;;  %vm87_vm14 = vcmask 622144   ;;  %vm93_vm15 = vcmask 589344   ;;  %vm99_vm0 = vcmask 556544  }
  0x16   :  { %67 = vrot.lane.b32.xlu0 %v209_v11, %s271_s13  ;;  %73 = vrot.lane.b32.xlu1 %v210_v12, %s272_s14  ;;  %s281_s14 = smov 44  }
  0x1a   :  { %79 = vrot.lane.b32.xlu0 %v211_v13, %s273_s19  ;;  %85 = vrot.lane.b32.xlu1 %v212_v14, %s274_s20  ;;  %s283_s20 = smov 36  }
  0x1e   :  { %91 = vrot.lane.b32.xlu0 %v213_v15, %s275_s25  ;;  %97 = vrot.lane.b32.xlu1 %v214_v16, %s276_s26  ;;  %s285_s26 = smov 28  }
  0x22   :  { %103 = vrot.lane.b32.xlu0 %v215_v17, %s277_s2  ;;  %109 = vrot.lane.b32.xlu1 %v216_v18, %s278_s3  ;;  %s287_s3 = smov 20  }
  0x26   :  { %115 = vrot.lane.b32.xlu0 %v217_v19, %s279_s8  ;;  %121 = vrot.lane.b32.xlu1 %v218_v20, %s280_s9  ;;  %s289_s9 = smov 12  }
  0x2a   :  { %127 = vrot.lane.b32.xlu0 %v219_v21, %s281_s14  ;;  %133 = vrot.lane.b32.xlu1 %v220_v22, %s282_s15 }
  0x2e   :  { %139 = vrot.lane.b32.xlu0 %v221_v23, %s283_s20  ;;  %145 = vrot.lane.b32.xlu1 %v222_v24, %s284_s21 }
  0x32   :  { %151 = vrot.lane.b32.xlu0 %v223_v25, %s285_s26  ;;  %157 = vrot.lane.b32.xlu1 %v224_v26, %s286_s27 }
  0x36   :  { %163 = vrot.lane.b32.xlu0 %v225_v27, %s287_s3  ;;  %169 = vrot.lane.b32.xlu1 %v226_v28, %s288_s4 }
  0x3a   :  { %175 = vrot.lane.b32.xlu0 %v227_v29, %s289_s9  ;;  %181 = vrot.lane.b32.xlu1 %v228_v30, %s290_s10 }
  0x3e   :  { %187 = vrot.lane.b32.xlu0 %v229_v31, %s291_s0 }
  0x74   :  { %v8_v32 = vpop.permute.xlu0 %7   ;;  %v20_v33 = vpop.permute.xlu1 %19  }
  0x75   :  { %10 = vst.msk [vmem:[#allocation0] sm:$0x1] %vm9_vm1, %v8_v32   ;;  %vm105_vm1 = vcmask 523744  }
  0x78   :  { %v14_v34 = vpop.permute.xlu0 %13   ;;  %v26_v35 = vpop.permute.xlu1 %25  }
  0x79   :  { %16 = vst.msk [vmem:[#allocation0] sm:$0x1] %vm15_vm2, %v14_v34   ;;  %vm111_vm2 = vcmask 490944  }
  0x7a   :  { %22 = vst.msk [vmem:[#allocation0] sm:$0x1] %vm21_vm3, %v20_v33   ;;  %vm117_vm3 = vcmask 458144  }
  0x7b   :  { %28 = vst.msk [vmem:[#allocation0] sm:$0x1] %vm27_vm4, %v26_v35   ;;  %vm123_vm4 = vcmask 425344  }
  0x7c   :  { %v32_v36 = vpop.permute.xlu0 %31   ;;  %v38_v37 = vpop.permute.xlu1 %37  }
  0x7d   :  { %34 = vst.msk [vmem:[#allocation0] sm:$0x1] %vm33_vm5, %v32_v36   ;;  %vm129_vm5 = vcmask 392544  }
  0x7e   :  { %40 = vst.msk [vmem:[#allocation0] sm:$0x1] %vm39_vm6, %v38_v37   ;;  %vm135_vm6 = vcmask 359744  }
  0x80   :  { %v44_v38 = vpop.permute.xlu0 %43   ;;  %v50_v39 = vpop.permute.xlu1 %49  }
  0x81   :  { %46 = vst.msk [vmem:[#allocation0] sm:$0x1] %vm45_vm7, %v44_v38   ;;  %vm141_vm7 = vcmask 326944  }
  0x82   :  { %52 = vst.msk [vmem:[#allocation0] sm:$0x1] %vm51_vm8, %v50_v39   ;;  %vm147_vm8 = vcmask 294144  }
  0x84   :  { %v56_v40 = vpop.permute.xlu0 %55   ;;  %v62_v41 = vpop.permute.xlu1 %61  }
  0x85   :  { %58 = vst.msk [vmem:[#allocation0] sm:$0x1] %vm57_vm9, %v56_v40   ;;  %vm153_vm9 = vcmask 261344  }
  0x86   :  { %64 = vst.msk [vmem:[#allocation0] sm:$0x1] %vm63_vm10, %v62_v41   ;;  %vm159_vm10 = vcmask 228544  }
  0x88   :  { %v68_v42 = vpop.permute.xlu0 %67   ;;  %v74_v43 = vpop.permute.xlu1 %73  }
  0x89   :  { %70 = vst.msk [vmem:[#allocation0] sm:$0x1] %vm69_vm11, %v68_v42   ;;  %vm165_vm11 = vcmask 195744  }
  0x8a   :  { %76 = vst.msk [vmem:[#allocation0] sm:$0x1] %vm75_vm12, %v74_v43   ;;  %vm171_vm12 = vcmask 162944  }
  0x8c   :  { %v80_v44 = vpop.permute.xlu0 %79   ;;  %v86_v45 = vpop.permute.xlu1 %85  }
  0x8d   :  { %82 = vst.msk [vmem:[#allocation0] sm:$0x1] %vm81_vm13, %v80_v44   ;;  %vm177_vm13 = vcmask 130144  }
  0x8e   :  { %88 = vst.msk [vmem:[#allocation0] sm:$0x1] %vm87_vm14, %v86_v45   ;;  %vm183_vm14 = vcmask 97344  }
  0x90   :  { %v92_v46 = vpop.permute.xlu0 %91   ;;  %v98_v47 = vpop.permute.xlu1 %97  }
  0x91   :  { %94 = vst.msk [vmem:[#allocation0] sm:$0x1] %vm93_vm15, %v92_v46   ;;  %vm189_vm15 = vcmask 64544  }
  0x92   :  { %100 = vst.msk [vmem:[#allocation0] sm:$0x1] %vm99_vm0, %v98_v47  }
  0x94   :  { %v104_v48 = vpop.permute.xlu0 %103   ;;  %v110_v49 = vpop.permute.xlu1 %109  }
  0x95   :  { %106 = vst.msk [vmem:[#allocation0] sm:$0x1] %vm105_vm1, %v104_v48  }
  0x96   :  { %112 = vst.msk [vmem:[#allocation0] sm:$0x1] %vm111_vm2, %v110_v49  }
  0x98   :  { %v116_v50 = vpop.permute.xlu0 %115   ;;  %v122_v51 = vpop.permute.xlu1 %121  }
  0x99   :  { %118 = vst.msk [vmem:[#allocation0] sm:$0x1] %vm117_vm3, %v116_v50  }
  0x9a   :  { %124 = vst.msk [vmem:[#allocation0] sm:$0x1] %vm123_vm4, %v122_v51  }
  0x9c   :  { %v128_v52 = vpop.permute.xlu0 %127   ;;  %v134_v53 = vpop.permute.xlu1 %133  }
  0x9d   :  { %130 = vst.msk [vmem:[#allocation0] sm:$0x1] %vm129_vm5, %v128_v52  }
  0x9e   :  { %136 = vst.msk [vmem:[#allocation0] sm:$0x1] %vm135_vm6, %v134_v53  }
  0xa0   :  { %v140_v54 = vpop.permute.xlu0 %139   ;;  %v146_v55 = vpop.permute.xlu1 %145  }
  0xa1   :  { %142 = vst.msk [vmem:[#allocation0] sm:$0x1] %vm141_vm7, %v140_v54  }
  0xa2   :  { %148 = vst.msk [vmem:[#allocation0] sm:$0x1] %vm147_vm8, %v146_v55  }
  0xa4   :  { %v152_v56 = vpop.permute.xlu0 %151   ;;  %v158_v57 = vpop.permute.xlu1 %157  }
  0xa5   :  { %154 = vst.msk [vmem:[#allocation0] sm:$0x1] %vm153_vm9, %v152_v56  }
  0xa6   :  { %160 = vst.msk [vmem:[#allocation0] sm:$0x1] %vm159_vm10, %v158_v57  }
  0xa8   :  { %v164_v58 = vpop.permute.xlu0 %163   ;;  %v170_v59 = vpop.permute.xlu1 %169  }
  0xa9   :  { %166 = vst.msk [vmem:[#allocation0] sm:$0x1] %vm165_vm11, %v164_v58  }
  0xaa   :  { %172 = vst.msk [vmem:[#allocation0] sm:$0x1] %vm171_vm12, %v170_v59  }
  0xac   :  { %v176_v60 = vpop.permute.xlu0 %175   ;;  %v182_v61 = vpop.permute.xlu1 %181  }
  0xad   :  { %178 = vst.msk [vmem:[#allocation0] sm:$0x1] %vm177_vm13, %v176_v60  }
  0xae   :  { %184 = vst.msk [vmem:[#allocation0] sm:$0x1] %vm183_vm14, %v182_v61  }
  0xb0   :  { %v188_v62 = vpop.permute.xlu0 %187  }
  0xb1   :  { %190 = vst.msk [vmem:[#allocation0] sm:$0x1] %vm189_vm15, %v188_v62  }
  0xb8   :  { %v195_v63 = vld [vmem:[#allocation0] sm:$0x1] }
  0xb9   :  { %198 = vst [vmem:[%s402_s1] sm:$0x1] %v195_v63 }

// kernel: process_forward.2
= control target key start
LH: loop header
LB: loop body
LE: loop exit
PB: predicated region body
PF: predicated region fallthrough
CT: control target
= control target key end

     0   :  { %s1077_s24 = smov 0   ;;  %s1238_s0 = inlined_call_operand.vmem [shape: bf16[2,8,128], index: 0, kind: input, shape index: {}]   ;;  %s1239_s1 = inlined_call_operand.vmem [shape: bf16[128,128], index: 1, kind: input, shape index: {}]   ;;  %s1240_s2 = inlined_call_operand.vmem [shape: f32[1,128], index: 2, kind: input, shape index: {}]   ;;  %s1241_s3 = inlined_call_operand.vmem [shape: bf16[384,128], index: 3, kind: input, shape index: {}]   ;;  %s1242_s4 = inlined_call_operand.vmem [shape: f32[1,128], index: 4, kind: input, shape index: {}]   ;;  %s1243_s5 = inlined_call_operand.vmem [shape: f32[2,8,128], index: 5, kind: output, shape index: {0}]   ;;  %s1244_s6 = inlined_call_operand.vmem [shape: f32[2,1,128], index: 6, kind: output, shape index: {1}]   ;;  %s1245_s7 = inlined_call_operand.vmem [shape: f32[2,1,128], index: 7, kind: output, shape index: {2}]  }
   0x1 LB: > { %s856_s25 = sadd.s32 4294967295, %s1033_s24   ;;  %p860_p0 = scmp.ge.s32.totalorder %s1033_s24, 1  ;;  %s1033_s24 = sphi %s1077_s24, %s18_s24  }
   0x2   : > { %p241_p1 = scmp.lt.s32.totalorder %s1033_s24, 3 }
   0x4   : > { %p242_p2 = pnand %p860_p0, %p241_p1 }
   0x5   : > { %p277_p3 = scmp.lt.s32.totalorder (!%p242_p2), %s856_s25, 1 }
   0x6   : > { %245 = sbr.rel (%p242_p2) target bundleno = 482 (0x1e2), region = 40 }
   0xb   : > { %v993_v0 = vld [vmem:[%s1239_s1 + $0x38] sm:$0xff]   ;;  %v1035_v1 = vmov 0.0   ;;  %v994_v2 = vld [vmem:[%s1239_s1 + $0x30] sm:$0xff]   ;;  %vm1036_vm0 = vmmov 0   ;;  %v995_v3 = vld [vmem:[%s1239_s1 + $0x28] sm:$0xff]   ;;  %s1249_s25 = smov (!%p277_p3, %s856_s25), 1 }
   0xc   : > { %943 = vmatprep.subr.bf16.mxu0 %v1035_v1  ;;  %959 = vmatprep.mubr.msk.bf16.mxu0 %vm1036_vm0, %v1035_v1  ;;  %v996_v4 = vld [vmem:[%s1239_s1 + $0x20] sm:$0xff]   ;;  %v1002_v5 = vld [vmem:[%s1241_s3 + $0x78] sm:$0xff]   ;;  %s861_s15 = sshll.u32 %s1249_s25, 2  ;;  %v998_v8 = vld [vmem:[%s1239_s1 + $0x10] sm:$0xff]   ;;  %vm404_vm1 = vcmask 1040384   ;;  %vm429_vm6 = vcmask 1043456   ;;  %s287_s18 = scalar_lea.vmem %s1244_s6, %s1249_s25 }
   0xd   : > { %944 = vmatpush3.bf16.msra.mxu0 %v993_v0  ;;  %v997_v6 = vld [vmem:[%s1239_s1 + $0x18] sm:$0xff]   ;;  %912 = vmatprep.subr.bf16.mxu1 %v1002_v5  ;;  %v999_v9 = vld [vmem:[%s1239_s1 + $0x8] sm:$0xff]   ;;  %v1000_v10 = vld [vmem:[%s1239_s1] sm:$0xff]   ;;  %s280_s28 = scalar_lea.vmem %s1238_s0, %s861_s15  ;;  %vm405_vm2 = vsmask.f32 256  ;;  %s862_s12 = sshll.u32 %s1249_s25, 3 }
   0xe   : > { %945 = vmatprep.subr.bf16.mxu0 %v1035_v1  ;;  %v1004_v7 = vld [vmem:[%s1241_s3 + $0x38] sm:$0xff]   ;;  %v292_v11 = vld [vmem:[%s280_s28] sm:$0xf]  ;;  %v1003_v13 = vld [vmem:[%s1241_s3 + $0xb0] sm:$0xff]   ;;  %vm410_vm3 = vsmask.f32 7938  ;;  %s284_s15 = scalar_lea.vmem %s1243_s5, %s862_s12  ;;  %s290_s21 = scalar_lea.vmem %s1245_s7, %s1249_s25 }
   0xf   : > { %913 = vmatpush3.bf16.msra.mxu1 %v1004_v7  ;;  %v1001_v12 = vld [vmem:[%s1241_s3 + $0xb8] sm:$0xff]   ;;  %v1005_v14 = vld [vmem:[%s1241_s3 + $0x70] sm:$0xff]   ;;  %v1006_v15 = vld [vmem:[%s1241_s3 + $0xa8] sm:$0xff]  }
  0x10   : > { %v1007_v16 = vld [vmem:[%s1241_s3 + $0x30] sm:$0xff]   ;;  %vm1151_vm4 = vmand %vm404_vm1, %vm405_vm2  ;;  %v407_v18 = vld [vmem:[#allocation2] sm:$0x1]  ;;  %914 = vmatprep.subr.bf16.mxu1 %v1005_v14 }
  0x11   : > { %946 = vmatpush3.bf16.msra.mxu0 %v994_v2  ;;  %v412_v19 = vld [vmem:[#allocation2 + $0x4] sm:$0x1]  ;;  %v408_v20 = vsel %vm1151_vm4, 0, %v407_v18  ;;  %vm411_vm5 = vmand %vm404_vm1, %vm410_vm3  ;;  %v1008_v22 = vld [vmem:[%s1241_s3 + $0x68] sm:$0xff]  }
  0x12   : > { %947 = vmatprep.subr.bf16.mxu0 %v1035_v1  ;;  %409 = vst [vmem:[#allocation2] sm:$0x1] %v408_v20  ;;  %v413_v21 = vsel %vm411_vm5, 0, %v412_v19  ;;  %v1009_v23 = vld [vmem:[%s1241_s3 + $0xa0] sm:$0xff]   ;;  %v1010_v24 = vld [vmem:[%s1241_s3 + $0x28] sm:$0xff]   ;;  %v1012_v26 = vld [vmem:[%s1241_s3 + $0x98] sm:$0xff]  }
  0x13   : > { %915 = vmatpush3.bf16.msra.mxu1 %v1007_v16  ;;  %414 = vst [vmem:[#allocation2 + $0x4] sm:$0x1] %v413_v21  ;;  %v1011_v25 = vld [vmem:[%s1241_s3 + $0x60] sm:$0xff]   ;;  %v1014_v28 = vld [vmem:[%s1241_s3 + $0x58] sm:$0xff]   ;;  %v1015_v29 = vld [vmem:[%s1241_s3 + $0x90] sm:$0xff]  }
  0x14   : > { %916 = vmatprep.subr.bf16.mxu1 %v1008_v22  ;;  %v1013_v27 = vld [vmem:[%s1241_s3 + $0x20] sm:$0xff]   ;;  %v1016_v30 = vld [vmem:[%s1241_s3 + $0x18] sm:$0xff]   ;;  %v1017_v31 = vld [vmem:[%s1241_s3 + $0x50] sm:$0xff]  }
  0x15   : > { %948 = vmatpush3.bf16.msra.mxu0 %v995_v3  ;;  %v1018_v32 = vld [vmem:[%s1241_s3 + $0x88] sm:$0xff]   ;;  %v1019_v33 = vld [vmem:[%s1241_s3 + $0x10] sm:$0xff]   ;;  %v1021_v35 = vld [vmem:[%s1241_s3 + $0x80] sm:$0xff]  }
  0x16   : > { %949 = vmatprep.subr.bf16.mxu0 %v1035_v1  ;;  %v1020_v34 = vld [vmem:[%s1241_s3 + $0x48] sm:$0xff]   ;;  %v1024_v37 = vld [vmem:[%s1241_s3 + $0x40] sm:$0xff]   ;;  %vm430_vm7 = vmand %vm429_vm6, %vm410_vm3 }
  0x17   : > { %917 = vmatpush3.bf16.msra.mxu1 %v1010_v24  ;;  %v1022_v36 = vld [vmem:[%s1241_s3 + $0x8] sm:$0xff]   ;;  %v1025_v38 = vld [vmem:[%s1241_s3] sm:$0xff]  }
  0x18   : > { %918 = vmatprep.subr.bf16.mxu1 %v1011_v25  ;;  %v863_v39 = vld [vmem:[%s1240_s2] ss:$0 sm:$0xff] }
  0x19   : > { %950 = vmatpush3.bf16.msra.mxu0 %v996_v4  ;;  %v431_v49 = vld [vmem:[#allocation2] sm:$0xf] }
  0x1a   : > { %951 = vmatprep.subr.bf16.mxu0 %v1035_v1  ;;  %v434_v50 = vld [vmem:[#allocation2 + $0x4] sm:$0x1] }
  0x1b   : > { %919 = vmatpush3.bf16.msra.mxu1 %v1013_v27 }
  0x1c   : > { %920 = vmatprep.subr.bf16.mxu1 %v1014_v28 }
  0x1d   : > { %952 = vmatpush3.bf16.msra.mxu0 %v997_v6  ;;  %v875_v6 = vld [vmem:[%s1242_s4] ss:$0 sm:$0xff] }
  0x1e   : > { %953 = vmatprep.subr.bf16.mxu0 %v1035_v1 }
  0x1f   : > { %921 = vmatpush3.bf16.msra.mxu1 %v1016_v30 }
  0x20   : > { %922 = vmatprep.subr.bf16.mxu1 %v1017_v31 }
  0x21   : > { %954 = vmatpush3.bf16.msra.mxu0 %v998_v8 }
  0x22   : > { %955 = vmatprep.subr.bf16.mxu0 %v1035_v1 }
  0x23   : > { %923 = vmatpush3.bf16.msra.mxu1 %v1019_v33 }
  0x24   : > { %924 = vmatprep.subr.bf16.mxu1 %v1020_v34 }
  0x25   : > { %956 = vmatpush3.bf16.msra.mxu0 %v999_v9 }
  0x26   : > { %957 = vmatprep.subr.bf16.mxu0 %v1035_v1 }
  0x27   : > { %925 = vmatpush3.bf16.msra.mxu1 %v1022_v36 }
  0x28   : > { %926 = vmatprep.subr.bf16.mxu1 %v1024_v37 }
  0x29   : > { %958 = vmatpush3.bf16.msra.mxu0 %v1000_v10 }
  0x2a   : > { %963 = vmatprep.subr.bf16.mxu0 %v1035_v1 }
  0x2b   : > { %927 = vmatpush3.bf16.msra.mxu1 %v1025_v38 }
  0x2c   : > { %960 = vmatmul.mubr.bf16.vlgmr.msra.gmra.mxu0 %v292_v11 }
  0x2d   : > { %964 = vmatpush3.bf16.msra.mxu0 %v1001_v12  ;;  %979 = vmatprep.mubr.msk.bf16.mxu0 %vm1036_vm0, %v1035_v1 }
  0x2e   : > { %965 = vmatprep.subr.bf16.mxu0 %v1035_v1 }
  0x31   : > { %966 = vmatpush3.bf16.msra.mxu0 %v1003_v13 }
  0x32   : > { %967 = vmatprep.subr.bf16.mxu0 %v1035_v1 }
  0x35   : > { %968 = vmatpush3.bf16.msra.mxu0 %v1006_v15 }
  0x36   : > { %969 = vmatprep.subr.bf16.mxu0 %v1035_v1 }
  0x39   : > { %970 = vmatpush3.bf16.msra.mxu0 %v1009_v23 }
  0x3a   : > { %971 = vmatprep.subr.bf16.mxu0 %v1035_v1 }
  0x3d   : > { %972 = vmatpush3.bf16.msra.mxu0 %v1012_v26 }
  0x3e   : > { %973 = vmatprep.subr.bf16.mxu0 %v1035_v1 }
  0x41   : > { %974 = vmatpush3.bf16.msra.mxu0 %v1015_v29 }
  0x42   : > { %975 = vmatprep.subr.bf16.mxu0 %v1035_v1 }
  0x45   : > { %976 = vmatpush3.bf16.msra.mxu0 %v1018_v32 }
  0x46   : > { %977 = vmatprep.subr.bf16.mxu0 %v1035_v1 }
  0x49   : > { %978 = vmatpush3.bf16.msra.mxu0 %v1021_v35 }
  0xec   : > { %v398_v40 = vpop.f32.mrf.mxu0 }
  0xed   : > { %v399_v41 = vadd.f32 %v863_v39, %v398_v40 }
  0xee   : > { %v961_v42 = vpop.f32.mrf.mxu0 }
  0xef   : > { %v902_v43 = vpack.c.bf16 %v399_v41, %v399_v41 }
  0xf0   : > { %v401_v44 = vpop.f32.mrf.mxu0 }
  0xf1   : > { %v420_v45 = vshrl.u32 %v902_v43, 16  ;;  %v423_v48 = vshll.u32 %v902_v43, 16 }
  0xf2   : > { %v962_v46 = vpop.f32.mrf.mxu0 }
  0xf3   : > { %v422_v47 = vrot.slane %v420_v45, 7 }
  0xf5   : > { %v425_v51 = vor.u32 %v423_v48, %v422_v47  ;;  %v426_v52 = vrot.slane %v422_v47, 4 }
  0xf7   : > { %v432_v53 = vsel %vm430_vm7, %v425_v51, %v431_v49  ;;  %v435_v54 = vsel %vm1151_vm4, %v426_v52, %v434_v50 }
  0xf8   : > { %433 = vst [vmem:[#allocation2] sm:$0xf] %v432_v53  ;;  %436 = vst [vmem:[#allocation2 + $0x4] sm:$0x1] %v435_v54 }
  0xff   : > { %v438_v55 = vld [vmem:[#allocation2 + $0x4] sm:$0x1]  ;;  %v439_v56 = vld [vmem:[#allocation2] sm:$0xe] }
 0x100   : > { %v437_v57 = vld [vmem:[#allocation2] sm:$0xf]  ;;  %v874_v58 = vcombine.low %v439_v56, %v438_v55 }
 0x101   : > { %v873_v59 = vcombine.low %v437_v57, %v438_v55 }
 0x102   : > { %v456_v60 = vrot.slane %v874_v58, 1 }
 0x103   : > { %v448_v61 = vshll.u32 %v873_v59, 16  ;;  %v446_v62 = vshrl.u32 %v873_v59, 16 }
 0x104   : > { %980 = vmatmul.mubr.bf16.vlgmr.msra.gmra.mxu0 %v456_v60 }
 0x105   : > { %v450_v63 = vrot.slane %v448_v61, 1 }
 0x107   : > { %v451_v0 = vor.u32 %v450_v63, %v446_v62 }
 0x109   : > { %689 = vmatprep.mubr.bf16.mxu1 %v451_v0 }
 0x10a   : > { %690 = vmatmul.mubr.bf16.vlgmr.msra.gmra.mxu1 %v437_v57 }
 0x1c4   : > { %v731_v1 = vpop.f32.mrf.mxu0 }
 0x1c6   : > { %v981_v2 = vpop.f32.mrf.mxu0 }
 0x1c8   : > { %v734_v3 = vpop.f32.mrf.mxu0 }
 0x1ca   : > { %v928_v4 = vpop.f32.mrf.mxu1  ;;  %v982_v5 = vpop.f32.mrf.mxu0 }
 0x1cc   : > { %v929_v7 = vpop.f32.mrf.mxu1 }
 0x1cd   : > { %v930_v8 = vadd.f32 %v929_v7, %v928_v4 }
 0x1ce   : > { %v931_v9 = vpop.f32.mrf.mxu1 }
 0x1cf   : > { %v692_v10 = vadd.f32 %v930_v8, %v875_v6 }
 0x1d0   : > { %v932_v11 = vpop.f32.mrf.mxu1 }
 0x1d1   : > { %v732_v12 = vadd.f32 %v731_v1, %v692_v10 }
 0x1d3   : > { %737 = vst [vmem:[%s284_s15] sm:$0xff] %v732_v12  ;;  %v738_v13 = vrot.slane %v732_v12, 4  ;;  %v745_v14 = vmul.f32 %v732_v12, %v732_v12 }
 0x1d5   : > { %v739_v15 = vadd.f32 %v738_v13, %v732_v12  ;;  %v746_v16 = vrot.slane %v745_v14, 4 }
 0x1d7   : > { %v740_v17 = vrot.slane %v739_v15, 2  ;;  %v747_v18 = vadd.f32 %v746_v16, %v745_v14 }
 0x1d9   : > { %v741_v19 = vadd.f32 %v740_v17, %v739_v15  ;;  %v748_v20 = vrot.slane %v747_v18, 2 }
 0x1db   : > { %v742_v21 = vrot.slane %v741_v19, 1  ;;  %v749_v22 = vadd.f32 %v748_v20, %v747_v18 }
 0x1dd   : > { %v743_v23 = vadd.f32 %v742_v21, %v741_v19  ;;  %v750_v24 = vrot.slane %v749_v22, 1 }
 0x1df   : > { %744 = vst [vmem:[%s287_s18] sm:$0x1] %v743_v23  ;;  %v751_v25 = vadd.f32 %v750_v24, %v749_v22 }
 0x1e1   : > { %752 = vst [vmem:[%s290_s21] sm:$0x1] %v751_v25 }
 0x1e2 PF: > { %s18_s24 = sadd.s32 1, %s1033_s24  }
 0x1e3   : > { %p15_p4 = scmp.ge.s32.totalorder %s18_s24, 4  }
 0x1e5   :  { %17 = sbr.rel (!%p15_p4) target bundleno = 1 (0x1), region = 94 }

// kernel: process_forward.3
= control target key start
LH: loop header
LB: loop body
LE: loop exit
PB: predicated region body
PF: predicated region fallthrough
CT: control target
= control target key end

     0   :  { %s1079_s27 = smov 0   ;;  %s1253_s0 = inlined_call_operand.vmem [shape: f32[2,8,128], index: 0, kind: input, shape index: {}, may-alias: {0,8}]   ;;  %s1254_s1 = inlined_call_operand.vmem [shape: bf16[2,8,128], index: 1, kind: input, shape index: {}]   ;;  %s1255_s2 = inlined_call_operand.vmem [shape: f32[1,128], index: 2, kind: input, shape index: {}]   ;;  %s1256_s3 = inlined_call_operand.vmem [shape: f32[1,128], index: 3, kind: input, shape index: {}]   ;;  %s1257_s4 = inlined_call_operand.vmem [shape: bf16[128,128], index: 4, kind: input, shape index: {}]   ;;  %s1258_s5 = inlined_call_operand.vmem [shape: f32[1,128], index: 5, kind: input, shape index: {}]   ;;  %s1259_s6 = inlined_call_operand.vmem [shape: bf16[384,128], index: 6, kind: input, shape index: {}]   ;;  %s1260_s7 = inlined_call_operand.vmem [shape: f32[1,128], index: 7, kind: input, shape index: {}]   ;;  %s1261_s8 = inlined_call_operand.vmem [shape: f32[2,8,128], index: 8, kind: output, shape index: {}, may-alias: {0,8}]  }
   0x1 LB: > { %s850_s28 = sadd.s32 4294967295, %s1030_s27   ;;  %p854_p0 = scmp.ge.s32.totalorder %s1030_s27, 1  ;;  %s1030_s27 = sphi %s1079_s27, %s18_s27  }
   0x2   : > { %p270_p1 = scmp.lt.s32.totalorder %s1030_s27, 3 }
   0x4   : > { %p271_p2 = pnand %p854_p0, %p270_p1 }
   0x5   : > { %p306_p3 = scmp.lt.s32.totalorder (!%p271_p2), %s850_s28, 1 }
   0x6   : > { %274 = sbr.rel (%p271_p2) target bundleno = 276 (0x114), region = 52 }
   0xb   : > { %v990_v0 = vld [vmem:[%s1257_s4 + $0x38] sm:$0xff]   ;;  %v1032_v1 = vmov 0.0   ;;  %v991_v2 = vld [vmem:[%s1257_s4 + $0x30] sm:$0xff]   ;;  %vm1033_vm0 = vmmov 0   ;;  %s1267_s28 = smov (!%p306_p3, %s850_s28), 1  ;;  %v992_v4 = vld [vmem:[%s1257_s4 + $0x28] sm:$0xff]  }
   0xc   : > { %940 = vmatprep.subr.bf16.mxu0 %v1032_v1  ;;  %956 = vmatprep.mubr.msk.bf16.mxu0 %vm1033_vm0, %v1032_v1  ;;  %v995_v3 = vld [vmem:[%s1259_s6 + $0x78] sm:$0xff]   ;;  %v998_v6 = vld [vmem:[%s1259_s6 + $0x70] sm:$0xff]   ;;  %s855_s19 = sshll.u32 %s1267_s28, 3  ;;  %v993_v7 = vld [vmem:[%s1257_s4 + $0x20] sm:$0xff]   ;;  %vm449_vm1 = vcmask 1040384   ;;  %vm474_vm6 = vcmask 1043456  }
   0xd   : > { %941 = vmatpush3.bf16.msra.mxu0 %v990_v0  ;;  %909 = vmatprep.subr.bf16.mxu1 %v995_v3  ;;  %v997_v5 = vld [vmem:[%s1259_s6 + $0x38] sm:$0xff]   ;;  %v1000_v8 = vld [vmem:[%s1259_s6 + $0x30] sm:$0xff]   ;;  %v1001_v9 = vld [vmem:[%s1259_s6 + $0x68] sm:$0xff]   ;;  %s309_s30 = scalar_lea.vmem %s1253_s0, %s855_s19  ;;  %vm450_vm2 = vsmask.f32 256  ;;  %s317_s12 = scalar_lea.vmem %s1261_s8, %s855_s19 }
   0xe   : > { %942 = vmatprep.subr.bf16.mxu0 %v1032_v1  ;;  %910 = vmatpush3.bf16.msra.mxu1 %v997_v5  ;;  %v1003_v10 = vld [vmem:[%s1259_s6 + $0x28] sm:$0xff]   ;;  %v994_v11 = vld [vmem:[%s1257_s4 + $0x18] sm:$0xff]   ;;  %v431_v12 = vld [vmem:[%s309_s30] sm:$0xff]  ;;  %vm455_vm4 = vsmask.f32 7938  ;;  %s856_s30 = sshll.u32 %s1267_s28, 2 }
   0xf   : > { %911 = vmatprep.subr.bf16.mxu1 %v998_v6  ;;  %v867_v13 = vld [vmem:[%s1255_s2] ss:$0 sm:$0xff]  ;;  %vm1142_vm3 = vmand %vm449_vm1, %vm450_vm2  ;;  %v457_v18 = vld [vmem:[#allocation2 + $0x4] sm:$0x1]  ;;  %s313_s17 = scalar_lea.vmem %s1254_s1, %s856_s30 }
  0x10   : > { %v439_v14 = vmul.f32 %v867_v13, %v431_v12  ;;  %v868_v15 = vld [vmem:[%s1256_s3] ss:$0 sm:$0xff]  ;;  %vm456_vm5 = vmand %vm449_vm1, %vm455_vm4  ;;  %v996_v22 = vld [vmem:[%s1257_s4 + $0x10] sm:$0xff]  }
  0x11   : > { %943 = vmatpush3.bf16.msra.mxu0 %v991_v2  ;;  %v452_v16 = vld [vmem:[#allocation2] sm:$0x1]  ;;  %v458_v23 = vsel %vm456_vm5, 0, %v457_v18  ;;  %v999_v26 = vld [vmem:[%s1257_s4 + $0x8] sm:$0xff]   ;;  %v1007_v28 = vld [vmem:[%s1259_s6 + $0x58] sm:$0xff]  }
  0x12   : > { %944 = vmatprep.subr.bf16.mxu0 %v1032_v1  ;;  %912 = vmatpush3.bf16.msra.mxu1 %v1000_v8  ;;  %v447_v19 = vadd.f32 %v868_v15, %v439_v14  ;;  %v453_v20 = vsel %vm1142_vm3, 0, %v452_v16  ;;  %v1004_v21 = vld [vmem:[%s1259_s6 + $0x60] sm:$0xff]   ;;  %459 = vst [vmem:[#allocation2 + $0x4] sm:$0x1] %v458_v23  ;;  %v1008_v29 = vld [vmem:[%s1259_s6 + $0x18] sm:$0xff]   ;;  %v1010_v32 = vld [vmem:[%s1259_s6 + $0x50] sm:$0xff]  }
  0x13   : > { %913 = vmatprep.subr.bf16.mxu1 %v1001_v9  ;;  %454 = vst [vmem:[#allocation2] sm:$0x1] %v453_v20  ;;  %v1005_v25 = vld [vmem:[%s1259_s6 + $0x20] sm:$0xff]   ;;  %vm1181_vm7 = vmand %vm474_vm6, %vm455_vm4  ;;  %v1011_v36 = vld [vmem:[%s1259_s6 + $0x10] sm:$0xff]  }
  0x14   : > { %v448_v24 = vmax.f32 %v447_v19, 0.0  ;;  %v1002_v33 = vld [vmem:[%s1257_s4] sm:$0xff]   ;;  %v1013_v41 = vld [vmem:[%s1259_s6 + $0x48] sm:$0xff]   ;;  %v1006_v43 = vld [vmem:[%s1259_s6 + $0xb8] sm:$0xff]  }
  0x15   : > { %945 = vmatpush3.bf16.msra.mxu0 %v992_v4  ;;  %v319_v42 = vld [vmem:[%s313_s17] sm:$0xf]  ;;  %v1014_v46 = vld [vmem:[%s1259_s6 + $0x8] sm:$0xff]   ;;  %v1009_v49 = vld [vmem:[%s1259_s6 + $0xb0] sm:$0xff]  }
  0x16   : > { %946 = vmatprep.subr.bf16.mxu0 %v1032_v1  ;;  %914 = vmatpush3.bf16.msra.mxu1 %v1003_v10  ;;  %v899_v27 = vpack.c.bf16 %v448_v24, %v448_v24  ;;  %v1016_v47 = vld [vmem:[%s1259_s6 + $0x40] sm:$0xff]   ;;  %v1012_v52 = vld [vmem:[%s1259_s6 + $0xa8] sm:$0xff]   ;;  %v1018_v59 = vld [vmem:[%s1259_s6 + $0x98] sm:$0xff]  }
  0x17   : > { %915 = vmatprep.subr.bf16.mxu1 %v1004_v21  ;;  %v1017_v48 = vld [vmem:[%s1259_s6] sm:$0xff]   ;;  %v1021_v60 = vld [vmem:[%s1259_s6 + $0x90] sm:$0xff]   ;;  %v1022_v62 = vld [vmem:[%s1259_s6 + $0x88] sm:$0xff]  }
  0x18   : > { %v465_v30 = vshrl.u32 %v899_v27, 16  ;;  %v468_v31 = vshll.u32 %v899_v27, 16  ;;  %v1015_v56 = vld [vmem:[%s1259_s6 + $0xa0] sm:$0xff]  }
  0x19   : > { %947 = vmatpush3.bf16.msra.mxu0 %v993_v7  ;;  %v479_v38 = vld [vmem:[#allocation2 + $0x4] sm:$0x1]  ;;  %v872_v12 = vld [vmem:[%s1260_s7] ss:$0 sm:$0xff] }
  0x1a   : > { %948 = vmatprep.subr.bf16.mxu0 %v1032_v1  ;;  %916 = vmatpush3.bf16.msra.mxu1 %v1005_v25  ;;  %v467_v34 = vrot.slane %v465_v30, 7  ;;  %v476_v37 = vld [vmem:[#allocation2] sm:$0xf] }
  0x1b   : > { %917 = vmatprep.subr.bf16.mxu1 %v1007_v28  ;;  %v1023_v0 = vld [vmem:[%s1259_s6 + $0x80] sm:$0xff]  }
  0x1c   : > { %v470_v39 = vor.u32 %v468_v31, %v467_v34  ;;  %v471_v40 = vrot.slane %v467_v34, 4 }
  0x1d   : > { %949 = vmatpush3.bf16.msra.mxu0 %v994_v11 }
  0x1e   : > { %950 = vmatprep.subr.bf16.mxu0 %v1032_v1  ;;  %918 = vmatpush3.bf16.msra.mxu1 %v1008_v29  ;;  %v477_v44 = vsel %vm1181_vm7, %v470_v39, %v476_v37  ;;  %v480_v45 = vsel %vm1142_vm3, %v471_v40, %v479_v38 }
  0x1f   : > { %919 = vmatprep.subr.bf16.mxu1 %v1010_v32  ;;  %478 = vst [vmem:[#allocation2] sm:$0xf] %v477_v44  ;;  %481 = vst [vmem:[#allocation2 + $0x4] sm:$0x1] %v480_v45 }
  0x21   : > { %951 = vmatpush3.bf16.msra.mxu0 %v996_v22 }
  0x22   : > { %952 = vmatprep.subr.bf16.mxu0 %v1032_v1  ;;  %920 = vmatpush3.bf16.msra.mxu1 %v1011_v36 }
  0x23   : > { %921 = vmatprep.subr.bf16.mxu1 %v1013_v41 }
  0x25   : > { %953 = vmatpush3.bf16.msra.mxu0 %v999_v26 }
  0x26   : > { %954 = vmatprep.subr.bf16.mxu0 %v1032_v1  ;;  %922 = vmatpush3.bf16.msra.mxu1 %v1014_v46  ;;  %v482_v50 = vld [vmem:[#allocation2] sm:$0xf]  ;;  %v483_v51 = vld [vmem:[#allocation2 + $0x4] sm:$0x1] }
  0x27   : > { %923 = vmatprep.subr.bf16.mxu1 %v1016_v47  ;;  %v870_v53 = vcombine.low %v482_v50, %v483_v51  ;;  %v484_v61 = vld [vmem:[#allocation2] sm:$0xe] }
  0x28   : > { %v871_v63 = vcombine.low %v484_v61, %v483_v51 }
  0x29   : > { %955 = vmatpush3.bf16.msra.mxu0 %v1002_v33  ;;  %v491_v54 = vshrl.u32 %v870_v53, 16  ;;  %v493_v55 = vshll.u32 %v870_v53, 16 }
  0x2a   : > { %960 = vmatprep.subr.bf16.mxu0 %v1032_v1  ;;  %924 = vmatpush3.bf16.msra.mxu1 %v1017_v48  ;;  %v501_v2 = vrot.slane %v871_v63, 1 }
  0x2b   : > { %v495_v57 = vrot.slane %v493_v55, 1 }
  0x2c   : > { %957 = vmatmul.mubr.bf16.vlgmr.msra.gmra.mxu0 %v319_v42 }
  0x2d   : > { %961 = vmatpush3.bf16.msra.mxu0 %v1006_v43  ;;  %976 = vmatprep.mubr.msk.bf16.mxu0 %vm1033_vm0, %v1032_v1  ;;  %v496_v58 = vor.u32 %v495_v57, %v491_v54 }
  0x2e   : > { %962 = vmatprep.subr.bf16.mxu0 %v1032_v1 }
  0x2f   : > { %734 = vmatprep.mubr.bf16.mxu1 %v496_v58 }
  0x30   : > { %735 = vmatmul.mubr.bf16.vlgmr.msra.gmra.mxu1 %v482_v50 }
  0x31   : > { %963 = vmatpush3.bf16.msra.mxu0 %v1009_v49 }
  0x32   : > { %964 = vmatprep.subr.bf16.mxu0 %v1032_v1 }
  0x35   : > { %965 = vmatpush3.bf16.msra.mxu0 %v1012_v52 }
  0x36   : > { %966 = vmatprep.subr.bf16.mxu0 %v1032_v1 }
  0x39   : > { %967 = vmatpush3.bf16.msra.mxu0 %v1015_v56 }
  0x3a   : > { %968 = vmatprep.subr.bf16.mxu0 %v1032_v1 }
  0x3d   : > { %969 = vmatpush3.bf16.msra.mxu0 %v1018_v59 }
  0x3e   : > { %970 = vmatprep.subr.bf16.mxu0 %v1032_v1 }
  0x41   : > { %971 = vmatpush3.bf16.msra.mxu0 %v1021_v60 }
  0x42   : > { %972 = vmatprep.subr.bf16.mxu0 %v1032_v1 }
  0x45   : > { %973 = vmatpush3.bf16.msra.mxu0 %v1022_v62 }
  0x46   : > { %974 = vmatprep.subr.bf16.mxu0 %v1032_v1  ;;  %v858_v1 = vld [vmem:[%s1258_s5] ss:$0 sm:$0xff] }
  0x49   : > { %975 = vmatpush3.bf16.msra.mxu0 %v1023_v0 }
  0x4c   : > { %977 = vmatmul.mubr.bf16.vlgmr.msra.gmra.mxu0 %v501_v2 }
  0xec   : > { %v425_v3 = vpop.f32.mrf.mxu0 }
  0xed   : > { %v426_v15 = vadd.f32 %v858_v1, %v425_v3 }
  0xee   : > { %v958_v4 = vpop.f32.mrf.mxu0 }
  0xf0   : > { %v428_v5 = vpop.f32.mrf.mxu0  ;;  %v925_v7 = vpop.f32.mrf.mxu1 }
  0xf2   : > { %v959_v6 = vpop.f32.mrf.mxu0  ;;  %v926_v8 = vpop.f32.mrf.mxu1 }
  0xf3   : > { %v927_v11 = vadd.f32 %v926_v8, %v925_v7 }
  0xf4   : > { %v928_v9 = vpop.f32.mrf.mxu1 }
  0xf5   : > { %v737_v13 = vadd.f32 %v927_v11, %v872_v12 }
  0xf6   : > { %v929_v10 = vpop.f32.mrf.mxu1 }
 0x10c   : > { %v776_v14 = vpop.f32.mrf.mxu0 }
 0x10d   : > { %v777_v16 = vadd.f32 %v776_v14, %v737_v13 }
 0x10e   : > { %v978_v17 = vpop.f32.mrf.mxu0 }
 0x10f   : > { %v782_v18 = vadd.f32 %v777_v16, %v426_v15 }
 0x110   : > { %v779_v19 = vpop.f32.mrf.mxu0 }
 0x111   : > { %v783_v20 = vmax.f32 %v782_v18, 0.0 }
 0x112   : > { %v979_v21 = vpop.f32.mrf.mxu0 }
 0x113   : > { %784 = vst [vmem:[%s317_s12] sm:$0xff] %v783_v20 }
 0x114 PF: > { %s18_s27 = sadd.s32 1, %s1030_s27  }
 0x115   : > { %p15_p4 = scmp.ge.s32.totalorder %s18_s27, 4  }
 0x117   :  { %17 = sbr.rel (!%p15_p4) target bundleno = 1 (0x1), region = 85 }

</bundles_post_ra>
